<compile_context>
chip_gen: v6e
topology: v6e:2x2x1
jax: 0.10.0
libtpu: 0.0.40
codegen_flags: <defaults>
</compile_context>

<pallas_src>
import functools

import jax
import jax.numpy as jnp
from jax.experimental import pallas as pl
from jax.experimental.pallas import tpu as pltpu

EPS = 1e-5
NEG_SLOPE = 0.2


def _convblock_kernel(x_ref, w_ref, o_ref, *scratch,
                      copies, Q, Ho, Wo, Ws, use_slab):
    # x_ref: (1, R, Lp)      polyphase-flattened reflect-padded input
    # w_ref: (Cout_t, KKC)   weight matrix (contraction order matches `copies`)
    # o_ref: (1, Cout_t, Ho*Wo)
    # scratch: (slab_ref, yc_ref) if use_slab else (yc_ref,)
    cout_t = o_ref.shape[1]

    if use_slab:
        slab_ref, yc_ref = scratch
        # Pack the lane-shifted copies of the polyphase slab once, then run a
        # single large-contraction MXU matmul (contraction = K*K*Cin).
        for dst, src, rows, off in copies:
            slab_ref[dst:dst + rows, :] = x_ref[0, src:src + rows, off:off + Q]
        acc = jnp.dot(w_ref[...], slab_ref[...],
                      preferred_element_type=jnp.float32)
    else:
        (yc_ref,) = scratch
        # Fallback: a few accumulating dots with contraction = s*s*Cin.
        acc = jnp.zeros((cout_t, Q), jnp.float32)
        for dst, src, rows, off in copies:
            acc = acc + jnp.dot(w_ref[:, dst:dst + rows],
                                x_ref[0, src:src + rows, off:off + Q],
                                preferred_element_type=jnp.float32)

    # Compact wide rows (length Ws, trailing junk columns) to dense rows
    # (length Wo).  Junk columns never reach the statistics or the output.
    for i in range(Ho):
        yc_ref[:, i * Wo:(i + 1) * Wo] = acc[:, i * Ws:i * Ws + Wo]

    # InstanceNorm2d (affine=False, biased variance) in f32, two-pass, then
    # LeakyReLU(0.2).  Conv bias omitted: cancelled exactly by mean subtraction.
    yc = yc_ref[...]
    inv_n = 1.0 / float(Ho * Wo)
    mean = jnp.sum(yc, axis=-1, keepdims=True) * inv_n
    d = yc - mean
    var = jnp.sum(d * d, axis=-1, keepdims=True) * inv_n
    y = d * jax.lax.rsqrt(var + EPS)
    o_ref[0] = jnp.where(y >= 0, y, NEG_SLOPE * y).astype(o_ref.dtype)


def conv_block_forward(x, weight, bias, *, stride,
                       compute_dtype=jnp.bfloat16, out_dtype=None,
                       slab_budget_bytes=12 * 2 ** 20):
    """ConvBlock forward. x: (N, Cin, H, W), weight: (Cout, Cin, 4, 4), bias: (Cout,).

    `bias` is accepted for API parity but unused: InstanceNorm cancels it exactly.
    """
    del bias
    N, Cin, H, W = x.shape
    Cout, _, K, _ = weight.shape
    s = int(stride)
    pad = 1
    out_dtype = x.dtype if out_dtype is None else out_dtype

    xp = jnp.pad(x, ((0, 0), (0, 0), (pad, pad), (pad, pad)), mode="reflect")
    Hp, Wp = H + 2 * pad, W + 2 * pad
    Ho = (Hp - K) // s + 1
    Wo = (Wp - K) // s + 1

    dmax = (K - 1) // s                         # max intra-phase tap offset
    Ws = Wo + dmax                              # wide output-row width
    Hs = Ho + dmax + (1 if dmax > 0 else 0)     # rows per phase slab (+ safety)
    Lp = Hs * Ws                                # flattened phase-slab length
    Q = Ho * Ws                                 # wide output positions / image
    R = s * s * Cin                             # polyphase rows per image
    KKC = K * K * Cin                           # fused contraction length
    HoWo = Ho * Wo

    # Polyphase decomposition:
    #   xph[n, (ph*s+pw)*Cin + ci, r*Ws + c] = xp[n, ci, r*s + ph, c*s + pw]
    # so tap (kh, kw) reads phase (kh%s, kw%s) at flat shift (kh//s)*Ws + kw//s.
    # For s == 1 the transpose below only moves size-1 dims (pure reshape, no
    # extra HBM pass); for s > 1 it is one strided pass over the input.
    xe = jnp.pad(xp, ((0, 0), (0, 0),
                      (0, max(0, s * Hs - Hp)), (0, max(0, s * Ws - Wp))))
    xe = xe[:, :, : s * Hs, : s * Ws]
    xph = xe.reshape(N, Cin, Hs, s, Ws, s)
    xph = xph.transpose(0, 3, 5, 1, 2, 4).reshape(N, R, Lp).astype(compute_dtype)

    # Copy plan + matching weight-matrix contraction order.
    if K % s == 0:
        G = K // s
        # One copy per (dh, dw) shift: ALL polyphase rows at a single lane
        # shift -> only G*G (= 4 for s=2) shifted copies, whole-row reads.
        copies = tuple(((dh * G + dw) * R, 0, R, dh * Ws + dw)
                       for dh in range(G) for dw in range(G))
        w_mat = weight.reshape(Cout, Cin, G, s, G, s)
        w_mat = w_mat.transpose(0, 2, 4, 3, 5, 1).reshape(Cout, KKC)
    else:
        # General stride: one copy per tap (still a single fused matmul).
        copies = tuple(((kh * K + kw) * Cin,
                        ((kh % s) * s + (kw % s)) * Cin,
                        Cin,
                        (kh // s) * Ws + (kw // s))
                       for kh in range(K) for kw in range(K))
        w_mat = weight.transpose(0, 2, 3, 1).reshape(Cout, KKC)
    w_mat = w_mat.astype(compute_dtype)

    cd_sz = jnp.dtype(compute_dtype).itemsize
    out_sz = jnp.dtype(out_dtype).itemsize
    use_slab = KKC * Q * cd_sz <= slab_budget_bytes
    # TODO(synk): if the slab does not fit AND the per-copy contraction is
    # still tiny (very small Cin with huge spatial), add Q-tiling here.

    # Cout tiling: keep >= 2 "parallel" grid points when possible (v7x: 2 TCs).
    cout_tile = Cout
    for cand in (256, 128, 64, 32, 16, 8):
        if Cout % cand == 0:
            cout_tile = cand
            break
    while N * (Cout // cout_tile) < 2 and cout_tile % 16 == 0:
        cout_tile //= 2

    kernel = functools.partial(_convblock_kernel, copies=copies, Q=Q,
                               Ho=Ho, Wo=Wo, Ws=Ws, use_slab=use_slab)

    scratch = [pltpu.VMEM((cout_tile, HoWo), jnp.float32)]          # compacted y
    if use_slab:
        scratch = [pltpu.VMEM((KKC, Q), compute_dtype)] + scratch   # patch slab

    # VMEM footprint (inputs/outputs double-buffered by the pipeline) with a
    # generation-aware cap: leave >= 12 MiB of physical VMEM for compiler
    # scratch, never exceed ~100 MiB even on 128 MiB parts.
    est = (2 * R * Lp * cd_sz
           + 2 * cout_tile * KKC * cd_sz
           + 2 * cout_tile * HoWo * out_sz
           + (KKC * Q * cd_sz if use_slab else 0)
           + cout_tile * HoWo * 4
           + 2 * cout_tile * Q * 4)
    try:
        phys = int(getattr(pltpu.get_tpu_info(), "vmem_capacity_bytes", 64 << 20))
    except Exception:  # pragma: no cover - conservative default (v7x)
        phys = 64 << 20
    cap = max(32 << 20, min(phys - (12 << 20), 100 << 20))
    vmem_limit = int(min(cap, max(32 << 20, est + (8 << 20))))

    out = pl.pallas_call(
        kernel,
        out_shape=jax.ShapeDtypeStruct((N, Cout, HoWo), out_dtype),
        grid_spec=pltpu.PrefetchScalarGridSpec(
            num_scalar_prefetch=0,
            grid=(N, Cout // cout_tile),
            in_specs=[
                pl.BlockSpec((1, R, Lp), lambda n, j: (n, 0, 0)),
                pl.BlockSpec((cout_tile, KKC), lambda n, j: (j, 0)),
            ],
            out_specs=pl.BlockSpec((1, cout_tile, HoWo), lambda n, j: (n, j, 0)),
            scratch_shapes=scratch,
        ),
        compiler_params=pltpu.CompilerParams(
            dimension_semantics=("parallel", "parallel"),
            vmem_limit_bytes=vmem_limit,
        ),
    )(xph, w_mat)

    # Dense (Ho*Wo) -> (Ho, Wo) is a metadata-only reshape: no extra HBM pass.
    return out.reshape(N, Cout, Ho, Wo)


if __name__ == "__main__":
    key = jax.random.PRNGKey(0)
    k_x, k_w, k_b = jax.random.split(key, 3)

    N, Cin, H, W = 2, 4, 16, 16
    Cout, K = 8, 4

    x = jax.random.normal(k_x, (N, Cin, H, W), dtype=jnp.float32)
    fan_in = Cin * K * K
    bound = 1.0 / (fan_in ** 0.5)
    weight = jax.random.uniform(k_w, (Cout, Cin, K, K), jnp.float32, -bound, bound)
    bias = jax.random.uniform(k_b, (Cout,), jnp.float32, -bound, bound)

    def reference(x, weight, bias, stride):
        xp = jnp.pad(x, ((0, 0), (0, 0), (1, 1), (1, 1)), mode="reflect")
        y = jax.lax.conv_general_dilated(
            xp, weight, window_strides=(stride, stride), padding="VALID",
            dimension_numbers=("NCHW", "OIHW", "NCHW"),
        ) + bias[None, :, None, None]
        mu = y.mean(axis=(2, 3), keepdims=True)
        var = y.var(axis=(2, 3), keepdims=True)
        y = (y - mu) / jnp.sqrt(var + EPS)
        return jnp.where(y >= 0, y, NEG_SLOPE * y)

    # (a) stride=2, default path: bf16 MXU operands, fused patch-slab matmul,
    #     f32 stats and output.
    ref2 = reference(x, weight, bias, 2)
    y2 = jax.jit(functools.partial(conv_block_forward, stride=2))(x, weight, bias)
    jax.block_until_ready(y2)
    assert y2.shape == ref2.shape == (N, Cout, 8, 8)
    err = float(jnp.max(jnp.abs(y2 - ref2)))
    assert err < 5e-2, err

    # (b) stride=2, f32-fed kernel, forced no-slab accumulate path (tight check).
    y2f = jax.jit(functools.partial(conv_block_forward, stride=2,
                                    compute_dtype=jnp.float32,
                                    slab_budget_bytes=0))(x, weight, bias)
    jax.block_until_ready(y2f)
    err = float(jnp.max(jnp.abs(y2f - ref2)))
    assert err < 1e-3, err

    # (c) stride=1, f32-fed kernel, fused patch-slab path.
    ref1 = reference(x, weight, bias, 1)
    y1 = jax.jit(functools.partial(conv_block_forward, stride=1,
                                   compute_dtype=jnp.float32))(x, weight, bias)
    jax.block_until_ready(y1)
    assert y1.shape == ref1.shape == (N, Cout, 15, 15)
    err = float(jnp.max(jnp.abs(y1 - ref1)))
    assert err < 1e-3, err

    print("KERNEL_OK")
</pallas_src>

<mosaic_0001>
module attributes {stable_mosaic.version = 11 : i64} {
  func.func @_convblock_kernel(%arg0: i32, %arg1: i32, %arg2: memref<1x16x90xbf16, #tpu.memory_space<vmem>>, %arg3: memref<8x64xbf16, #tpu.memory_space<vmem>>, %arg4: memref<1x8x64xf32, #tpu.memory_space<vmem>>, %arg5: memref<64x72xbf16, #tpu.memory_space<vmem>>, %arg6: memref<8x64xf32, #tpu.memory_space<vmem>>) attributes {dimension_semantics = [#tpu.dimension_semantics<parallel>, #tpu.dimension_semantics<parallel>], iteration_bounds = array<i64: 2, 1>, scalar_prefetch = 0 : i64, scratch_operands = 2 : i64, tpu.core_type = #tpu.core_type<tc>, window_params = [{transform_indices = @transform_0, window_bounds = array<i64: 1, 16, 90>}, {transform_indices = @transform_1, window_bounds = array<i64: 8, 64>}, {transform_indices = @transform_2, window_bounds = array<i64: 1, 8, 64>}]} {
    %c0 = arith.constant 0 : index
    %c0_0 = arith.constant 0 : index
    %c0_1 = arith.constant 0 : index
    %0 = vector.load %arg2[%c0, %c0_0, %c0_1] : memref<1x16x90xbf16, #tpu.memory_space<vmem>>, vector<1x16x72xbf16>
    %1 = vector.shape_cast %0 : vector<1x16x72xbf16> to vector<16x72xbf16>
    %c0_2 = arith.constant 0 : index
    %c0_3 = arith.constant 0 : index
    %2 = vector.load %arg5[%c0_2, %c0_3] : memref<64x72xbf16, #tpu.memory_space<vmem>>, vector<16x72xbf16>
    tpu.vector_store %arg5[%c0_2, %c0_3], %1 {strides = array<i32>} : memref<64x72xbf16, #tpu.memory_space<vmem>>, vector<16x72xbf16>,
    %c0_4 = arith.constant 0 : index
    %c0_5 = arith.constant 0 : index
    %c1 = arith.constant 1 : index
    %3 = vector.load %arg2[%c0_4, %c0_5, %c1] : memref<1x16x90xbf16, #tpu.memory_space<vmem>>, vector<1x16x72xbf16>
    %4 = vector.shape_cast %3 : vector<1x16x72xbf16> to vector<16x72xbf16>
    %c16 = arith.constant 16 : index
    %c0_6 = arith.constant 0 : index
    %5 = vector.load %arg5[%c16, %c0_6] : memref<64x72xbf16, #tpu.memory_space<vmem>>, vector<16x72xbf16>
    tpu.vector_store %arg5[%c16, %c0_6], %4 {strides = array<i32>} : memref<64x72xbf16, #tpu.memory_space<vmem>>, vector<16x72xbf16>,
    %c0_7 = arith.constant 0 : index
    %c0_8 = arith.constant 0 : index
    %c9 = arith.constant 9 : index
    %6 = vector.load %arg2[%c0_7, %c0_8, %c9] : memref<1x16x90xbf16, #tpu.memory_space<vmem>>, vector<1x16x72xbf16>
    %7 = vector.shape_cast %6 : vector<1x16x72xbf16> to vector<16x72xbf16>
    %c32 = arith.constant 32 : index
    %c0_9 = arith.constant 0 : index
    %8 = vector.load %arg5[%c32, %c0_9] : memref<64x72xbf16, #tpu.memory_space<vmem>>, vector<16x72xbf16>
    tpu.vector_store %arg5[%c32, %c0_9], %7 {strides = array<i32>} : memref<64x72xbf16, #tpu.memory_space<vmem>>, vector<16x72xbf16>,
    %c0_10 = arith.constant 0 : index
    %c0_11 = arith.constant 0 : index
    %c10 = arith.constant 10 : index
    %9 = vector.load %arg2[%c0_10, %c0_11, %c10] : memref<1x16x90xbf16, #tpu.memory_space<vmem>>, vector<1x16x72xbf16>
    %10 = vector.shape_cast %9 : vector<1x16x72xbf16> to vector<16x72xbf16>
    %c48 = arith.constant 48 : index
    %c0_12 = arith.constant 0 : index
    %11 = vector.load %arg5[%c48, %c0_12] : memref<64x72xbf16, #tpu.memory_space<vmem>>, vector<16x72xbf16>
    tpu.vector_store %arg5[%c48, %c0_12], %10 {strides = array<i32>} : memref<64x72xbf16, #tpu.memory_space<vmem>>, vector<16x72xbf16>,
    %c0_13 = arith.constant 0 : index
    %c0_14 = arith.constant 0 : index
    %12 = vector.load %arg3[%c0_13, %c0_14] : memref<8x64xbf16, #tpu.memory_space<vmem>>, vector<8x64xbf16>
    %c0_15 = arith.constant 0 : index
    %c0_16 = arith.constant 0 : index
    %13 = vector.load %arg5[%c0_15, %c0_16] : memref<64x72xbf16, #tpu.memory_space<vmem>>, vector<64x72xbf16>
    %cst = arith.constant dense<0.000000e+00> : vector<8x72xf32>
    %14 = tpu.matmul %12, %13, %cst {dimension_numbers = #tpu.dot_dimension_numbers<[1], [0], [0], [1], [0, 0, 1, 1], [], []>} : vector<8x64xbf16>, vector<64x72xbf16>, vector<8x72xf32> -> vector<8x72xf32>
    %15 = vector.extract_strided_slice %14 {offsets = [0, 0], sizes = [8, 8], strides = [1, 1]} : vector<8x72xf32> to vector<8x8xf32>
    %c0_17 = arith.constant 0 : index
    %c0_18 = arith.constant 0 : index
    %16 = vector.load %arg6[%c0_17, %c0_18] : memref<8x64xf32, #tpu.memory_space<vmem>>, vector<8x8xf32>
    tpu.vector_store %arg6[%c0_17, %c0_18], %15 {strides = array<i32>} : memref<8x64xf32, #tpu.memory_space<vmem>>, vector<8x8xf32>,
    %17 = vector.extract_strided_slice %14 {offsets = [0, 9], sizes = [8, 8], strides = [1, 1]} : vector<8x72xf32> to vector<8x8xf32>
    %c0_19 = arith.constant 0 : index
    %c8 = arith.constant 8 : index
    %18 = vector.load %arg6[%c0_19, %c8] : memref<8x64xf32, #tpu.memory_space<vmem>>, vector<8x8xf32>
    tpu.vector_store %arg6[%c0_19, %c8], %17 {strides = array<i32>} : memref<8x64xf32, #tpu.memory_space<vmem>>, vector<8x8xf32>,
    %19 = vector.extract_strided_slice %14 {offsets = [0, 18], sizes = [8, 8], strides = [1, 1]} : vector<8x72xf32> to vector<8x8xf32>
    %c0_20 = arith.constant 0 : index
    %c16_21 = arith.constant 16 : index
    %20 = vector.load %arg6[%c0_20, %c16_21] : memref<8x64xf32, #tpu.memory_space<vmem>>, vector<8x8xf32>
    tpu.vector_store %arg6[%c0_20, %c16_21], %19 {strides = array<i32>} : memref<8x64xf32, #tpu.memory_space<vmem>>, vector<8x8xf32>,
    %21 = vector.extract_strided_slice %14 {offsets = [0, 27], sizes = [8, 8], strides = [1, 1]} : vector<8x72xf32> to vector<8x8xf32>
    %c0_22 = arith.constant 0 : index
    %c24 = arith.constant 24 : index
    %22 = vector.load %arg6[%c0_22, %c24] : memref<8x64xf32, #tpu.memory_space<vmem>>, vector<8x8xf32>
    tpu.vector_store %arg6[%c0_22, %c24], %21 {strides = array<i32>} : memref<8x64xf32, #tpu.memory_space<vmem>>, vector<8x8xf32>,
    %23 = vector.extract_strided_slice %14 {offsets = [0, 36], sizes = [8, 8], strides = [1, 1]} : vector<8x72xf32> to vector<8x8xf32>
    %c0_23 = arith.constant 0 : index
    %c32_24 = arith.constant 32 : index
    %24 = vector.load %arg6[%c0_23, %c32_24] : memref<8x64xf32, #tpu.memory_space<vmem>>, vector<8x8xf32>
    tpu.vector_store %arg6[%c0_23, %c32_24], %23 {strides = array<i32>} : memref<8x64xf32, #tpu.memory_space<vmem>>, vector<8x8xf32>,
    %25 = vector.extract_strided_slice %14 {offsets = [0, 45], sizes = [8, 8], strides = [1, 1]} : vector<8x72xf32> to vector<8x8xf32>
    %c0_25 = arith.constant 0 : index
    %c40 = arith.constant 40 : index
    %26 = vector.load %arg6[%c0_25, %c40] : memref<8x64xf32, #tpu.memory_space<vmem>>, vector<8x8xf32>
    tpu.vector_store %arg6[%c0_25, %c40], %25 {strides = array<i32>} : memref<8x64xf32, #tpu.memory_space<vmem>>, vector<8x8xf32>,
    %27 = vector.extract_strided_slice %14 {offsets = [0, 54], sizes = [8, 8], strides = [1, 1]} : vector<8x72xf32> to vector<8x8xf32>
    %c0_26 = arith.constant 0 : index
    %c48_27 = arith.constant 48 : index
    %28 = vector.load %arg6[%c0_26, %c48_27] : memref<8x64xf32, #tpu.memory_space<vmem>>, vector<8x8xf32>
    tpu.vector_store %arg6[%c0_26, %c48_27], %27 {strides = array<i32>} : memref<8x64xf32, #tpu.memory_space<vmem>>, vector<8x8xf32>,
    %29 = vector.extract_strided_slice %14 {offsets = [0, 63], sizes = [8, 8], strides = [1, 1]} : vector<8x72xf32> to vector<8x8xf32>
    %c0_28 = arith.constant 0 : index
    %c56 = arith.constant 56 : index
    %30 = vector.load %arg6[%c0_28, %c56] : memref<8x64xf32, #tpu.memory_space<vmem>>, vector<8x8xf32>
    tpu.vector_store %arg6[%c0_28, %c56], %29 {strides = array<i32>} : memref<8x64xf32, #tpu.memory_space<vmem>>, vector<8x8xf32>,
    %c0_29 = arith.constant 0 : index
    %c0_30 = arith.constant 0 : index
    %31 = vector.load %arg6[%c0_29, %c0_30] : memref<8x64xf32, #tpu.memory_space<vmem>>, vector<8x64xf32>
    %cst_31 = arith.constant dense<0.000000e+00> : vector<8xf32>
    %32 = vector.multi_reduction <add>, %31, %cst_31 [1] : vector<8x64xf32> to vector<8xf32>
    %33 = vector.shape_cast %32 : vector<8xf32> to vector<8x1xf32>
    %cst_32 = arith.constant 1.562500e-02 : f32
    %34 = vector.broadcast %cst_32 : f32 to vector<8x1xf32>
    %35 = arith.mulf %33, %34 : vector<8x1xf32>
    %36 = vector.broadcast %35 : vector<8x1xf32> to vector<8x64xf32>
    %37 = arith.subf %31, %36 : vector<8x64xf32>
    %38 = arith.mulf %37, %37 : vector<8x64xf32>
    %cst_33 = arith.constant dense<0.000000e+00> : vector<8xf32>
    %39 = vector.multi_reduction <add>, %38, %cst_33 [1] : vector<8x64xf32> to vector<8xf32>
    %40 = vector.shape_cast %39 : vector<8xf32> to vector<8x1xf32>
    %cst_34 = arith.constant 1.562500e-02 : f32
    %41 = vector.broadcast %cst_34 : f32 to vector<8x1xf32>
    %42 = arith.mulf %40, %41 : vector<8x1xf32>
    %cst_35 = arith.constant 9.99999974E-6 : f32
    %43 = vector.broadcast %cst_35 : f32 to vector<8x1xf32>
    %44 = arith.addf %42, %43 : vector<8x1xf32>
    %45 = math.rsqrt %44 : vector<8x1xf32>
    %46 = vector.broadcast %45 : vector<8x1xf32> to vector<8x64xf32>
    %47 = arith.mulf %37, %46 : vector<8x64xf32>
    %cst_36 = arith.constant 0.000000e+00 : f32
    %48 = vector.broadcast %cst_36 : f32 to vector<8x64xf32>
    %49 = arith.cmpf oge, %47, %48 : vector<8x64xf32>
    %cst_37 = arith.constant 2.000000e-01 : f32
    %50 = vector.broadcast %cst_37 : f32 to vector<8x64xf32>
    %51 = arith.mulf %50, %47 : vector<8x64xf32>
    %52 = arith.select %49, %47, %51 : vector<8x64xi1>, vector<8x64xf32>
    %c0_38 = arith.constant 0 : index
    %c0_39 = arith.constant 0 : index
    %c0_40 = arith.constant 0 : index
    %53 = vector.load %arg4[%c0_38, %c0_39, %c0_40] : memref<1x8x64xf32, #tpu.memory_space<vmem>>, vector<1x8x64xf32>
    %54 = vector.shape_cast %53 : vector<1x8x64xf32> to vector<8x64xf32>
    %55 = vector.shape_cast %52 : vector<8x64xf32> to vector<1x8x64xf32>
    tpu.vector_store %arg4[%c0_38, %c0_39, %c0_40], %55 {strides = array<i32>} : memref<1x8x64xf32, #tpu.memory_space<vmem>>, vector<1x8x64xf32>,
    return
  }
  func.func @transform_0(%arg0: i32, %arg1: i32) -> (i32, i32, i32) {
    %c0_i32 = arith.constant 0 : i32
    %c0_i32_0 = arith.constant 0 : i32
    %c0_i32_1 = arith.constant 0 : i32
    return %arg0, %c0_i32, %c0_i32_0 : i32, i32, i32
  }
  func.func @transform_1(%arg0: i32, %arg1: i32) -> (i32, i32) {
    %c0_i32 = arith.constant 0 : i32
    %c0_i32_0 = arith.constant 0 : i32
    return %arg1, %c0_i32 : i32, i32
  }
  func.func @transform_2(%arg0: i32, %arg1: i32) -> (i32, i32, i32) {
    %c0_i32 = arith.constant 0 : i32
    %c0_i32_0 = arith.constant 0 : i32
    return %arg0, %arg1, %c0_i32 : i32, i32, i32
  }
}

</mosaic_0001>

<bundles_post_ra>
// kernel: conv_block_forward.1
= control target key start
LH: loop header
LB: loop body
LE: loop exit
PB: predicated region body
PF: predicated region fallthrough
CT: control target
= control target key end

     0   :  { %s566_s9 = smov 0   ;;  %s568_s10 = smov 0   ;;  %s624_s0 = inlined_call_operand.vmem [shape: bf16[2,16,90], index: 0, kind: input, shape index: {}]   ;;  %s625_s1 = inlined_call_operand.vmem [shape: bf16[8,64], index: 1, kind: input, shape index: {}]   ;;  %s626_s2 = inlined_call_operand.vmem [shape: f32[2,8,64], index: 2, kind: output, shape index: {}]  }
   0x1   :  { %s570_s11 = smov 0  }
   0x2 LB: > { %s24_s12 = sadd.s32 1, %s534_s10  ;;  %p446_p0 = scmp.ge.s32.totalorder %s538_s11, 1  ;;  %s538_s11 = sphi %s570_s11, %s12_s11   ;;  %s534_s10 = sphi %s568_s10, %s628_s10   ;;  %s530_s9 = sphi %s566_s9, %s627_s9  }
   0x3   : > { %p26_p1 = scmp.ge.s32.totalorder %s24_s12, 2  ;;  %p135_p2 = scmp.lt.s32.totalorder %s538_s11, 3 }
   0x5   : > { %s630_s12 = smov (%p26_p1, %s24_s12), 0  ;;  %p136_p3 = pnand %p446_p0, %p135_p2 }
   0x6   : > { %p163_p4 = scmp.lt.s32.totalorder (!%p136_p3), %s530_s9, 1  ;;  %s541_s17 = smov (!%p136_p3), 118  }
   0x7   : > { %139 = sbr.rel (%p136_p3) target bundleno = 794 (0x31a), region = 28  ;;  %s542_s18 = smov (!%p136_p3), 119  }
   0x8   : > { %s543_s19 = smov (!%p136_p3), 127   ;;  %s545_s22 = smov (!%p136_p3), 126  }
   0x9   : > { %s546_s23 = smov (!%p136_p3), 124   ;;  %s547_s24 = smov (!%p136_p3), 125  }
   0xa   : > { %s548_s25 = smov (!%p136_p3), 122   ;;  %s549_s26 = smov (!%p136_p3), 123  }
   0xb   : > { %s550_s27 = smov (!%p136_p3), 121  }
   0xc   : > { %s632_s9 = smov (!%p163_p4, %s530_s9), 1  ;;  %v540_v0 = vmov 0.0   ;;  %vm182_vm0 = vcmask 584704   ;;  %vm544_vm1 = vmmov 0   ;;  %v221_v19 = vld [vmem:[%s625_s1] sm:$0xf] }
   0xd   : > { %s457_s13 = sshll.u32 %s632_s9, 3  ;;  %463 = vmatprep.subr.bf16.mxu0 %v540_v0  ;;  %471 = vmatprep.mubr.msk.bf16.mxu0 %vm544_vm1, %v540_v0  ;;  %vm254_vm2 = vcmask 523264   ;;  %vm298_vm3 = vcmask 64512   ;;  %vm304_vm4 = vcmask 130112   ;;  %vm309_vm5 = vcmask 195712  }
   0xe   : > { %s167_s16 = scalar_lea.vmem %s624_s0, %s457_s13  ;;  %vm314_vm6 = vcmask 261312   ;;  %vm319_vm7 = vcmask 326912   ;;  %vm324_vm8 = vcmask 392512   ;;  %vm329_vm9 = vcmask 458112   ;;  %s178_s30 = scalar_lea.vmem %s626_s2, %s457_s13 }
   0xf   : > { %v209_v1 = vld [vmem:[%s167_s16] sm:$0xf]  ;;  %v181_v3 = vld [vmem:[%s167_s16 + $0x4] sm:$0xf]  ;;  %vm334_vm10 = vcmask 523712  }
  0x10   : > { %v180_v2 = vld [vmem:[%s167_s16] sm:$0xf]  ;;  %213 = vrot.lane.b32.xlu0 %v209_v1, %s541_s17  ;;  %184 = vst.msk [vmem:[#allocation2 + $0x4] sm:$0xf] %vm182_vm0, %v181_v3  ;;  %v210_v5 = vld [vmem:[%s167_s16 + $0x4] sm:$0xf] }
  0x11   : > { %v197_v4 = vld [vmem:[%s167_s16] sm:$0xf]  ;;  %183 = vst.msk [vmem:[#allocation2] sm:$0xf] %vm182_vm0, %v180_v2  ;;  %v198_v6 = vld [vmem:[%s167_s16 + $0x4] sm:$0xf] }
  0x12   : > { %201 = vrot.lane.b32.xlu1 %v197_v4, %s542_s18  ;;  %v185_v7 = vld [vmem:[%s167_s16] sm:$0xf]  ;;  %v186_v8 = vld [vmem:[%s167_s16 + $0x4] sm:$0xf] }
  0x14   : > { %215 = vrot.lane.b32.xlu0 %v210_v5, %s541_s17 }
  0x16   : > { %203 = vrot.lane.b32.xlu1 %v198_v6, %s542_s18 }
  0x18   : > { %189 = vrot.lane.b32.xlu0 %v185_v7, %s543_s19  ;;  %v513_v18 = vld [vmem:[#allocation2] sm:$0xff]  }
  0x1a   : > { %191 = vrot.lane.b32.xlu1 %v186_v8, %s543_s19 }
  0x82   : > { %v214_v9 = vpop.permute.xlu0 %213 }
  0x83   : > { %219 = vst.msk [vmem:[#allocation2 + $0x18] sm:$0xf] %vm182_vm0, %v214_v9 }
  0x84   : > { %v202_v10 = vpop.permute.xlu1 %201 }
  0x85   : > { %207 = vst.msk [vmem:[#allocation2 + $0x10] sm:$0xf] %vm182_vm0, %v202_v10 }
  0x86   : > { %v216_v11 = vpop.permute.xlu0 %215 }
  0x87   : > { %220 = vst.msk [vmem:[#allocation2 + $0x1c] sm:$0xf] %vm182_vm0, %v216_v11 }
  0x88   : > { %v204_v12 = vpop.permute.xlu1 %203 }
  0x89   : > { %208 = vst.msk [vmem:[#allocation2 + $0x14] sm:$0xf] %vm182_vm0, %v204_v12 }
  0x8a   : > { %v190_v13 = vpop.permute.xlu0 %189 }
  0x8b   : > { %195 = vst.msk [vmem:[#allocation2 + $0x8] sm:$0xf] %vm182_vm0, %v190_v13 }
  0x8c   : > { %v192_v14 = vpop.permute.xlu1 %191 }
  0x8d   : > { %196 = vst.msk [vmem:[#allocation2 + $0xc] sm:$0xf] %vm182_vm0, %v192_v14 }
  0x8e   : > { %v510_v15 = vld [vmem:[#allocation2 + $0x18] sm:$0xff]  }
  0x8f   : > { %464 = vmatpush3.bf16.msra.mxu0 %v510_v15 }
  0x90   : > { %465 = vmatprep.subr.bf16.mxu0 %v540_v0  ;;  %v511_v16 = vld [vmem:[#allocation2 + $0x10] sm:$0xff]  }
  0x93   : > { %466 = vmatpush3.bf16.msra.mxu0 %v511_v16 }
  0x94   : > { %v512_v17 = vld [vmem:[#allocation2 + $0x8] sm:$0xff]   ;;  %467 = vmatprep.subr.bf16.mxu0 %v540_v0 }
  0x97   : > { %468 = vmatpush3.bf16.msra.mxu0 %v512_v17 }
  0x98   : > { %469 = vmatprep.subr.bf16.mxu0 %v540_v0 }
  0x9b   : > { %470 = vmatpush3.bf16.msra.mxu0 %v513_v18 }
  0x9e   : > { %472 = vmatmul.mubr.msk.bf16.vlgmr.msra.gmra.mxu0 %vm254_vm2, %v221_v19 }
 0x15e   : > { %v292_v20 = vpop.f32.mrf.mxu0 }
 0x15f   : > { %306 = vrot.lane.b32.xlu1 %v292_v20, %s545_s22  ;;  %301 = vrot.lane.b32.xlu0 %v292_v20, %s543_s19  ;;  %299 = vst.msk [vmem:[#allocation3] sm:$0xff] %vm298_vm3, %v292_v20 }
 0x160   : > { %v473_v21 = vpop.f32.mrf.mxu0 }
 0x162   : > { %v295_v22 = vpop.f32.mrf.mxu0 }
 0x163   : > { %316 = vrot.lane.b32.xlu1 %v292_v20, %s546_s23  ;;  %311 = vrot.lane.b32.xlu0 %v292_v20, %s547_s24 }
 0x164   : > { %v474_v23 = vpop.f32.mrf.mxu0 }
 0x167   : > { %326 = vrot.lane.b32.xlu1 %v292_v20, %s548_s25  ;;  %321 = vrot.lane.b32.xlu0 %v292_v20, %s549_s26 }
 0x16b   : > { %331 = vrot.lane.b32.xlu0 %v292_v20, %s550_s27 }
 0x1d1   : > { %v307_v24 = vpop.permute.xlu1 %306  ;;  %v302_v25 = vpop.permute.xlu0 %301 }
 0x1d2   : > { %305 = vst.msk [vmem:[#allocation3] sm:$0xff] %vm304_vm4, %v302_v25 }
 0x1d3   : > { %310 = vst.msk [vmem:[#allocation3] sm:$0xff] %vm309_vm5, %v307_v24 }
 0x1d5   : > { %v317_v26 = vpop.permute.xlu1 %316  ;;  %v312_v27 = vpop.permute.xlu0 %311 }
 0x1d6   : > { %315 = vst.msk [vmem:[#allocation3] sm:$0xff] %vm314_vm6, %v312_v27 }
 0x1d7   : > { %320 = vst.msk [vmem:[#allocation3] sm:$0xff] %vm319_vm7, %v317_v26 }
 0x1d9   : > { %v327_v28 = vpop.permute.xlu1 %326  ;;  %v322_v29 = vpop.permute.xlu0 %321 }
 0x1da   : > { %325 = vst.msk [vmem:[#allocation3] sm:$0xff] %vm324_vm8, %v322_v29 }
 0x1db   : > { %330 = vst.msk [vmem:[#allocation3] sm:$0xff] %vm329_vm9, %v327_v28 }
 0x1dd   : > { %v332_v30 = vpop.permute.xlu0 %331 }
 0x1de   : > { %335 = vst.msk [vmem:[#allocation3] sm:$0xff] %vm334_vm10, %v332_v30 }
 0x1e5   : > { %v336_v31 = vld [vmem:[#allocation3] sm:$0xff] }
 0x1e6   : > { %v337_v32 = vsel %vm254_vm2, %v336_v31, 0.0 }
 0x1e7   : > { %338 = vadd.xlane.f32.xlu1 %v337_v32 }
 0x270   : > { %v339_v33 = vpop.xlane.xlu1 %338 }
 0x271   : > { %v340_v34 = vmul.f32 0.015625, %v339_v33 }
 0x273   : > { %v341_v35 = vsub.f32 %v336_v31, %v340_v34 }
 0x275   : > { %v342_v36 = vmul.f32 %v341_v35, %v341_v35 }
 0x277   : > { %v343_v37 = vsel %vm254_vm2, %v342_v36, 0.0 }
 0x278   : > { %344 = vadd.xlane.f32.xlu0 %v343_v37 }
 0x301   : > { %v345_v38 = vpop.xlane.xlu0 %344 }
 0x302   : > { %v346_v39 = vmul.f32 0.015625, %v345_v38 }
 0x304   : > { %v347_v40 = vadd.f32 1e-05, %v346_v39 }
 0x306   : > { %514 = vrsqrt.f32 %v347_v40 }
 0x313   : > { %v515_v41 = vpop.eup %514 }
 0x314   : > { %v349_v42 = vmul.f32 %v515_v41, %v341_v35 }
 0x316   : > { %vm350_vm11 = vcmp.ge.f32.partialorder %v349_v42, 0.0  ;;  %v351_v43 = vmul.f32 0.2, %v349_v42 }
 0x318   : > { %v352_v44 = vsel %vm350_vm11, %v349_v42, %v351_v43 }
 0x319   : > { %353 = vst.msk [vmem:[%s178_s30] sm:$0xff] %vm254_vm2, %v352_v44 }
 0x31a PF: > { %s12_s11 = sadd.s32 1, %s538_s11   ;;  %s627_s9 = smov %s534_s10 }
 0x31b   : > { %p9_p5 = scmp.ge.s32.totalorder %s12_s11, 4   ;;  %s628_s10 = smov %s630_s12 }
 0x31d   :  { %11 = sbr.rel (!%p9_p5) target bundleno = 2 (0x2), region = 61 }

</bundles_post_ra>
